<compile_context>
chip_gen: v7x
topology: tpu7x:2x2x1
jax: 0.10.0
libtpu: 0.0.40
codegen_flags: <defaults>
</compile_context>

<pallas_src>
import jax
import jax.numpy as jnp
from jax.experimental import pallas as pl
from jax.experimental.pallas import tpu as pltpu

# Logical / padded feature sizes.
F_IN = 784                      # fc1 K dimension (unpadded; 784 = full-dim block)
H1, H2, H3 = 256, 128, 64
N_OUT, N_OUT_PAD = 10, 128      # fc4 N dimension padded to 128 lanes (lane-dense)
NEG_PAD = -1e30                 # bias for padded logit columns (never wins max)


def mlp_kernel(x_ref, w1_ref, b1_ref, w2_ref, b2_ref, w3_ref, b3_ref,
               w4_ref, b4_ref, o_ref):
    """Full forward pass for one batch tile, fully resident in VMEM."""
    # Cast the streamed x tile to bf16 in-kernel (MXU fast path); accumulate
    # in f32, do bias/ReLU/log_softmax epilogue in f32.
    x = x_ref[...].astype(jnp.bfloat16)

    # fc1 + ReLU
    h = jnp.dot(x, w1_ref[...],
                preferred_element_type=jnp.float32) + b1_ref[...]
    h = jnp.maximum(h, 0.0).astype(jnp.bfloat16)

    # fc2 + ReLU
    h = jnp.dot(h, w2_ref[...],
                preferred_element_type=jnp.float32) + b2_ref[...]
    h = jnp.maximum(h, 0.0).astype(jnp.bfloat16)

    # fc3 + ReLU
    h = jnp.dot(h, w3_ref[...],
                preferred_element_type=jnp.float32) + b3_ref[...]
    h = jnp.maximum(h, 0.0).astype(jnp.bfloat16)

    # fc4 (padded to 128 output lanes)
    logits = jnp.dot(h, w4_ref[...],
                     preferred_element_type=jnp.float32) + b4_ref[...]

    # Numerically stable log_softmax along dim=1. Padded columns carry a
    # ~-1e30 bias so they never win the row max and contribute exp(.) == 0 to
    # the sum; the real 10 columns are identical to an unpadded log_softmax.
    # (Restricting exp/sum to the first 10 lanes is not worth it: EUP/VPU
    # slots have slack in this memory-bound kernel.)
    m = jnp.max(logits, axis=-1, keepdims=True)
    z = logits - m
    lse = jnp.log(jnp.sum(jnp.exp(z), axis=-1, keepdims=True))
    o_ref[...] = (z - lse).astype(o_ref.dtype)


def _round_up(x, m):
    return ((x + m - 1) // m) * m


def mlp_forward(x, params, *, batch_tile=512, out_dtype=jnp.float32):
    """x: (B, 784) float. Returns (B, 10) `out_dtype` log-probabilities."""
    w1, b1, w2, b2, w3, b3, w4, b4 = params
    B = x.shape[0]
    assert x.shape[1] == F_IN

    # Batch tile: multiple of 8 sublanes (x stays in its input dtype; f32
    # sublane granularity is 8). Capped at ceil(B/2) so the parallel batch
    # grid has >= 2 steps whenever B allows (keeps both v7x TCs busy), and at
    # batch_tile=512 for HBM streaming efficiency without VMEM pressure.
    half = _round_up(-(-B // 2), 8)
    tb = max(8, min(batch_tile, half, _round_up(B, 8)))
    b_pad = _round_up(B, tb)

    # x goes in untouched (no feature padding, no wrapper dtype cast). Only
    # pad the batch remainder when B is not a multiple of the tile.
    if b_pad != B:
        x = jnp.pad(x, ((0, b_pad - B), (0, 0)))

    # ---- weight/bias layout prep (tiny, one-time-ish XLA ops) -------------
    w1p = w1.astype(jnp.bfloat16)                              # (784, 256)
    w2p = w2.astype(jnp.bfloat16)                              # (256, 128)
    w3p = w3.astype(jnp.bfloat16)                              # (128, 64)
    w4p = jnp.zeros((H3, N_OUT_PAD), jnp.bfloat16).at[:, :N_OUT].set(
        w4.astype(jnp.bfloat16))                               # (64, 128)

    b1p = b1.astype(jnp.float32).reshape(1, H1)
    b2p = b2.astype(jnp.float32).reshape(1, H2)
    b3p = b3.astype(jnp.float32).reshape(1, H3)
    b4p = jnp.full((1, N_OUT_PAD), NEG_PAD, jnp.float32).at[:, :N_OUT].set(
        b4.astype(jnp.float32).reshape(1, N_OUT))

    grid = (b_pad // tb,)
    const = lambda i: (0, 0)   # weights/biases: same block every step -> resident

    out_itemsize = jnp.dtype(out_dtype).itemsize
    flops = 2 * b_pad * (F_IN * H1 + H1 * H2 + H2 * H3 + H3 * N_OUT_PAD)
    bytes_accessed = (
        x.size * x.dtype.itemsize + b_pad * N_OUT_PAD * out_itemsize
        + (w1p.size + w2p.size + w3p.size + w4p.size) * 2
        + (b1p.size + b2p.size + b3p.size + b4p.size) * 4)

    out = pl.pallas_call(
        mlp_kernel,
        out_shape=jax.ShapeDtypeStruct((b_pad, N_OUT_PAD), out_dtype),
        grid=grid,
        in_specs=[
            pl.BlockSpec((tb, F_IN), lambda i: (i, 0)),       # x tile (streams)
            pl.BlockSpec((F_IN, H1), const),                  # w1 (resident)
            pl.BlockSpec((1, H1), const),                     # b1
            pl.BlockSpec((H1, H2), const),                    # w2
            pl.BlockSpec((1, H2), const),                     # b2
            pl.BlockSpec((H2, H3), const),                    # w3
            pl.BlockSpec((1, H3), const),                     # b3
            pl.BlockSpec((H3, N_OUT_PAD), const),             # w4 (padded N)
            pl.BlockSpec((1, N_OUT_PAD), const),              # b4 (padded N)
        ],
        out_specs=pl.BlockSpec((tb, N_OUT_PAD), lambda i: (i, 0)),
        compiler_params=pltpu.CompilerParams(
            dimension_semantics=("parallel",),
            vmem_limit_bytes=32 * 1024 * 1024,
        ),
        cost_estimate=pl.CostEstimate(
            flops=flops,
            transcendentals=b_pad * (N_OUT_PAD + 1),
            bytes_accessed=bytes_accessed,
        ),
    )(x, w1p, b1p, w2p, b2p, w3p, b3p, w4p, b4p)

    # TODO(synk): for inference/training pipelines, fuse the consumer
    # (argmax / NLL gather) into the kernel so only <=10 values per row leave
    # VMEM instead of the padded 128-wide slab sliced here.
    return out[:B, :N_OUT]


def init_linear(key, fan_in, fan_out):
    """Matches torch.nn.Linear default init: U(-1/sqrt(fan_in), +1/sqrt(fan_in))."""
    kw, kb = jax.random.split(key)
    bound = 1.0 / float(fan_in) ** 0.5
    w = jax.random.uniform(kw, (fan_in, fan_out), jnp.float32, -bound, bound)
    b = jax.random.uniform(kb, (1, fan_out), jnp.float32, -bound, bound)
    return w, b


def init_params(key):
    k1, k2, k3, k4 = jax.random.split(key, 4)
    w1, b1 = init_linear(k1, F_IN, H1)
    w2, b2 = init_linear(k2, H1, H2)
    w3, b3 = init_linear(k3, H2, H3)
    w4, b4 = init_linear(k4, H3, N_OUT)
    return (w1, b1, w2, b2, w3, b3, w4, b4)


def reference_forward(x, params):
    """Pure-JAX reference using the same bf16-input / f32-accumulate recipe."""
    w1, b1, w2, b2, w3, b3, w4, b4 = params

    def dot_bf16(a, w):
        return jax.lax.dot(a.astype(jnp.bfloat16), w.astype(jnp.bfloat16),
                           preferred_element_type=jnp.float32)

    h = jnp.maximum(dot_bf16(x, w1) + b1, 0.0)
    h = jnp.maximum(dot_bf16(h, w2) + b2, 0.0)
    h = jnp.maximum(dot_bf16(h, w3) + b3, 0.0)
    logits = dot_bf16(h, w4) + b4
    return jax.nn.log_softmax(logits, axis=1)


if __name__ == "__main__":
    key = jax.random.PRNGKey(0)
    k_params, k_x = jax.random.split(key)

    params = init_params(k_params)
    # Small batch of flattened 28x28 "images" (batch, 784).
    x = jax.random.normal(k_x, (8, 784), dtype=jnp.float32)

    out = jax.block_until_ready(mlp_forward(x, params))
    ref = reference_forward(x, params)

    assert out.shape == (8, 10)
    assert jnp.allclose(out, ref, atol=2e-3, rtol=2e-3), "Pallas output mismatch"

    print("KERNEL_OK")
</pallas_src>

<mosaic_0001>
module attributes {stable_mosaic.version = 11 : i64} {
  func.func @mlp_kernel(%arg0: i32, %arg1: memref<8x784xf32, #tpu.memory_space<vmem>>, %arg2: memref<784x256xbf16, #tpu.memory_space<vmem>>, %arg3: memref<1x256xf32, #tpu.memory_space<vmem>>, %arg4: memref<256x128xbf16, #tpu.memory_space<vmem>>, %arg5: memref<1x128xf32, #tpu.memory_space<vmem>>, %arg6: memref<128x64xbf16, #tpu.memory_space<vmem>>, %arg7: memref<1x64xf32, #tpu.memory_space<vmem>>, %arg8: memref<64x128xbf16, #tpu.memory_space<vmem>>, %arg9: memref<1x128xf32, #tpu.memory_space<vmem>>, %arg10: memref<8x128xf32, #tpu.memory_space<vmem>>) attributes {dimension_semantics = [#tpu.dimension_semantics<parallel>], iteration_bounds = array<i64: 1>, scalar_prefetch = 0 : i64, scratch_operands = 0 : i64, tpu.core_type = #tpu.core_type<tc>, window_params = [{transform_indices = @transform_0, window_bounds = array<i64: 8, 784>}, {pipeline_mode = #tpu.pipeline_mode<synchronous>, transform_indices = @transform_1, window_bounds = array<i64: 784, 256>}, {pipeline_mode = #tpu.pipeline_mode<synchronous>, transform_indices = @transform_2, window_bounds = array<i64: 1, 256>}, {pipeline_mode = #tpu.pipeline_mode<synchronous>, transform_indices = @transform_3, window_bounds = array<i64: 256, 128>}, {pipeline_mode = #tpu.pipeline_mode<synchronous>, transform_indices = @transform_4, window_bounds = array<i64: 1, 128>}, {pipeline_mode = #tpu.pipeline_mode<synchronous>, transform_indices = @transform_5, window_bounds = array<i64: 128, 64>}, {pipeline_mode = #tpu.pipeline_mode<synchronous>, transform_indices = @transform_6, window_bounds = array<i64: 1, 64>}, {pipeline_mode = #tpu.pipeline_mode<synchronous>, transform_indices = @transform_7, window_bounds = array<i64: 64, 128>}, {pipeline_mode = #tpu.pipeline_mode<synchronous>, transform_indices = @transform_8, window_bounds = array<i64: 1, 128>}, {transform_indices = @transform_9, window_bounds = array<i64: 8, 128>}]} {
    %c0 = arith.constant 0 : index
    %c0_0 = arith.constant 0 : index
    %0 = vector.load %arg1[%c0, %c0_0] : memref<8x784xf32, #tpu.memory_space<vmem>>, vector<8x784xf32>
    %1 = arith.truncf %0 : vector<8x784xf32> to vector<8x784xbf16>
    %c0_1 = arith.constant 0 : index
    %c0_2 = arith.constant 0 : index
    %2 = vector.load %arg2[%c0_1, %c0_2] : memref<784x256xbf16, #tpu.memory_space<vmem>>, vector<784x256xbf16>
    %cst = arith.constant dense<0.000000e+00> : vector<8x256xf32>
    %3 = tpu.matmul %1, %2, %cst {dimension_numbers = #tpu.dot_dimension_numbers<[1], [0], [0], [1], [0, 0, 1, 1], [], []>} : vector<8x784xbf16>, vector<784x256xbf16>, vector<8x256xf32> -> vector<8x256xf32>
    %c0_3 = arith.constant 0 : index
    %c0_4 = arith.constant 0 : index
    %4 = vector.load %arg3[%c0_3, %c0_4] : memref<1x256xf32, #tpu.memory_space<vmem>>, vector<1x256xf32>
    %5 = vector.broadcast %4 : vector<1x256xf32> to vector<8x256xf32>
    %6 = arith.addf %3, %5 : vector<8x256xf32>
    %cst_5 = arith.constant 0.000000e+00 : f32
    %7 = vector.broadcast %cst_5 : f32 to vector<8x256xf32>
    %8 = arith.maximumf %6, %7 : vector<8x256xf32>
    %9 = arith.truncf %8 : vector<8x256xf32> to vector<8x256xbf16>
    %c0_6 = arith.constant 0 : index
    %c0_7 = arith.constant 0 : index
    %10 = vector.load %arg4[%c0_6, %c0_7] : memref<256x128xbf16, #tpu.memory_space<vmem>>, vector<256x128xbf16>
    %cst_8 = arith.constant dense<0.000000e+00> : vector<8x128xf32>
    %11 = tpu.matmul %9, %10, %cst_8 {dimension_numbers = #tpu.dot_dimension_numbers<[1], [0], [0], [1], [0, 0, 1, 1], [], []>} : vector<8x256xbf16>, vector<256x128xbf16>, vector<8x128xf32> -> vector<8x128xf32>
    %c0_9 = arith.constant 0 : index
    %c0_10 = arith.constant 0 : index
    %12 = vector.load %arg5[%c0_9, %c0_10] : memref<1x128xf32, #tpu.memory_space<vmem>>, vector<1x128xf32>
    %13 = vector.broadcast %12 : vector<1x128xf32> to vector<8x128xf32>
    %14 = arith.addf %11, %13 : vector<8x128xf32>
    %cst_11 = arith.constant 0.000000e+00 : f32
    %15 = vector.broadcast %cst_11 : f32 to vector<8x128xf32>
    %16 = arith.maximumf %14, %15 : vector<8x128xf32>
    %17 = arith.truncf %16 : vector<8x128xf32> to vector<8x128xbf16>
    %c0_12 = arith.constant 0 : index
    %c0_13 = arith.constant 0 : index
    %18 = vector.load %arg6[%c0_12, %c0_13] : memref<128x64xbf16, #tpu.memory_space<vmem>>, vector<128x64xbf16>
    %cst_14 = arith.constant dense<0.000000e+00> : vector<8x64xf32>
    %19 = tpu.matmul %17, %18, %cst_14 {dimension_numbers = #tpu.dot_dimension_numbers<[1], [0], [0], [1], [0, 0, 1, 1], [], []>} : vector<8x128xbf16>, vector<128x64xbf16>, vector<8x64xf32> -> vector<8x64xf32>
    %c0_15 = arith.constant 0 : index
    %c0_16 = arith.constant 0 : index
    %20 = vector.load %arg7[%c0_15, %c0_16] : memref<1x64xf32, #tpu.memory_space<vmem>>, vector<1x64xf32>
    %21 = vector.broadcast %20 : vector<1x64xf32> to vector<8x64xf32>
    %22 = arith.addf %19, %21 : vector<8x64xf32>
    %cst_17 = arith.constant 0.000000e+00 : f32
    %23 = vector.broadcast %cst_17 : f32 to vector<8x64xf32>
    %24 = arith.maximumf %22, %23 : vector<8x64xf32>
    %25 = arith.truncf %24 : vector<8x64xf32> to vector<8x64xbf16>
    %c0_18 = arith.constant 0 : index
    %c0_19 = arith.constant 0 : index
    %26 = vector.load %arg8[%c0_18, %c0_19] : memref<64x128xbf16, #tpu.memory_space<vmem>>, vector<64x128xbf16>
    %cst_20 = arith.constant dense<0.000000e+00> : vector<8x128xf32>
    %27 = tpu.matmul %25, %26, %cst_20 {dimension_numbers = #tpu.dot_dimension_numbers<[1], [0], [0], [1], [0, 0, 1, 1], [], []>} : vector<8x64xbf16>, vector<64x128xbf16>, vector<8x128xf32> -> vector<8x128xf32>
    %c0_21 = arith.constant 0 : index
    %c0_22 = arith.constant 0 : index
    %28 = vector.load %arg9[%c0_21, %c0_22] : memref<1x128xf32, #tpu.memory_space<vmem>>, vector<1x128xf32>
    %29 = vector.broadcast %28 : vector<1x128xf32> to vector<8x128xf32>
    %30 = arith.addf %27, %29 : vector<8x128xf32>
    %cst_23 = arith.constant dense<0xFF800000> : vector<8xf32>
    %31 = vector.multi_reduction <maximumf>, %30, %cst_23 [1] : vector<8x128xf32> to vector<8xf32>
    %32 = vector.shape_cast %31 : vector<8xf32> to vector<8x1xf32>
    %33 = vector.broadcast %32 : vector<8x1xf32> to vector<8x128xf32>
    %34 = arith.subf %30, %33 : vector<8x128xf32>
    %35 = math.exp %34 : vector<8x128xf32>
    %cst_24 = arith.constant dense<0.000000e+00> : vector<8xf32>
    %36 = vector.multi_reduction <add>, %35, %cst_24 [1] : vector<8x128xf32> to vector<8xf32>
    %37 = vector.shape_cast %36 : vector<8xf32> to vector<8x1xf32>
    %38 = math.log %37 : vector<8x1xf32>
    %39 = vector.broadcast %38 : vector<8x1xf32> to vector<8x128xf32>
    %40 = arith.subf %34, %39 : vector<8x128xf32>
    %c0_25 = arith.constant 0 : index
    %c0_26 = arith.constant 0 : index
    %41 = vector.load %arg10[%c0_25, %c0_26] : memref<8x128xf32, #tpu.memory_space<vmem>>, vector<8x128xf32>
    tpu.vector_store %arg10[%c0_25, %c0_26], %40 {strides = array<i32>} : memref<8x128xf32, #tpu.memory_space<vmem>>, vector<8x128xf32>,
    return
  }
  func.func @transform_0(%arg0: i32) -> (i32, i32) {
    %c0_i32 = arith.constant 0 : i32
    %c0_i32_0 = arith.constant 0 : i32
    return %arg0, %c0_i32 : i32, i32
  }
  func.func @transform_1(%arg0: i32) -> (i32, i32) {
    %c0_i32 = arith.constant 0 : i32
    %c0_i32_0 = arith.constant 0 : i32
    %c0_i32_1 = arith.constant 0 : i32
    return %c0_i32, %c0_i32_0 : i32, i32
  }
  func.func @transform_2(%arg0: i32) -> (i32, i32) {
    %c0_i32 = arith.constant 0 : i32
    %c0_i32_0 = arith.constant 0 : i32
    %c0_i32_1 = arith.constant 0 : i32
    return %c0_i32, %c0_i32_0 : i32, i32
  }
  func.func @transform_3(%arg0: i32) -> (i32, i32) {
    %c0_i32 = arith.constant 0 : i32
    %c0_i32_0 = arith.constant 0 : i32
    %c0_i32_1 = arith.constant 0 : i32
    return %c0_i32, %c0_i32_0 : i32, i32
  }
  func.func @transform_4(%arg0: i32) -> (i32, i32) {
    %c0_i32 = arith.constant 0 : i32
    %c0_i32_0 = arith.constant 0 : i32
    %c0_i32_1 = arith.constant 0 : i32
    return %c0_i32, %c0_i32_0 : i32, i32
  }
  func.func @transform_5(%arg0: i32) -> (i32, i32) {
    %c0_i32 = arith.constant 0 : i32
    %c0_i32_0 = arith.constant 0 : i32
    %c0_i32_1 = arith.constant 0 : i32
    return %c0_i32, %c0_i32_0 : i32, i32
  }
  func.func @transform_6(%arg0: i32) -> (i32, i32) {
    %c0_i32 = arith.constant 0 : i32
    %c0_i32_0 = arith.constant 0 : i32
    %c0_i32_1 = arith.constant 0 : i32
    return %c0_i32, %c0_i32_0 : i32, i32
  }
  func.func @transform_7(%arg0: i32) -> (i32, i32) {
    %c0_i32 = arith.constant 0 : i32
    %c0_i32_0 = arith.constant 0 : i32
    %c0_i32_1 = arith.constant 0 : i32
    return %c0_i32, %c0_i32_0 : i32, i32
  }
  func.func @transform_8(%arg0: i32) -> (i32, i32) {
    %c0_i32 = arith.constant 0 : i32
    %c0_i32_0 = arith.constant 0 : i32
    %c0_i32_1 = arith.constant 0 : i32
    return %c0_i32, %c0_i32_0 : i32, i32
  }
  func.func @transform_9(%arg0: i32) -> (i32, i32) {
    %c0_i32 = arith.constant 0 : i32
    %c0_i32_0 = arith.constant 0 : i32
    return %arg0, %c0_i32 : i32, i32
  }
}

</mosaic_0001>

<bundles_post_ra>
// kernel: tpu_custom_call.1
= control target key start
LH: loop header
LB: loop body
LE: loop exit
PB: predicated region body
PF: predicated region fallthrough
CT: control target
= control target key end

     0   :  { %14 = vsyncpa [#allocation3], 0  ;;  %s1899_s0 = inlined_call_operand.vmem [shape: f32[8,784], index: 0, kind: input, shape index: {}]   ;;  %s1900_s1 = inlined_call_operand.hbm [shape: bf16[784,256], index: 1, kind: input, shape index: {}]   ;;  %s1901_s2 = inlined_call_operand.vmem [shape: f32[1,256], index: 2, kind: input, shape index: {}]   ;;  %s1902_s3 = inlined_call_operand.hbm [shape: bf16[256,128], index: 3, kind: input, shape index: {}]   ;;  %s1903_s4 = inlined_call_operand.vmem [shape: f32[1,128], index: 4, kind: input, shape index: {}]   ;;  %s1904_s5 = inlined_call_operand.vmem [shape: bf16[128,64], index: 5, kind: input, shape index: {}]   ;;  %s1905_s6 = inlined_call_operand.vmem [shape: f32[1,64], index: 6, kind: input, shape index: {}]   ;;  %s1906_s7 = inlined_call_operand.vmem [shape: bf16[64,128], index: 7, kind: input, shape index: {}]   ;;  %s1907_s8 = inlined_call_operand.vmem [shape: f32[1,128], index: 8, kind: input, shape index: {}]   ;;  %s1908_s9 = inlined_call_operand.hbm [shape: f32[8,128], index: 9, kind: output, shape index: {}]  }
   0x1   :  { %15 = vsyncpa [#allocation6], 0 }
   0x2   :  { %16 = vsyncpa [#allocation4], 0  ;;  %s1720_s30 = smov [#allocation2]   ;;  %s1648_s13 = scalar_lea.hbm %s1900_s1, 12544 }
   0x3   :  { %s24_s10 = sshll.u32 %s1720_s30, 4  ;;  %p1649_p0 = scmp.ne.s32.totalorder %s1900_s1, %s1648_s13  ;;  %s25_s10 = int_to_ptr.vmem [resolvable:$true] %s24_s10 }
   0x4   :  { %p1652_p1 = scmp.lt.u32.totalorder %s1648_s13, %s1900_s1 }
   0x6   :  { %p1654_p2 = pnand %p1652_p1, %p1649_p0 }
   0x8   :  { %1657 = shalt.err (!%p1654_p2)
}
   0x9   :  { %s1658_s18 = scalar_lea.vmem %s25_s10, 12544  ;;  %p1663_p4 = scmp.lt.s32.totalorder %s25_s10, %s25_s10 }
   0xa   :  { %p1659_p3 = scmp.ne.s32.totalorder %s25_s10, %s1658_s18  ;;  %p1664_p5 = scmp.lt.s32.totalorder %s1658_s18, %s1658_s18 }
   0xc   :  { %p1665_p6 = por %p1664_p5, %p1663_p4 }
   0xe   :  { %p1666_p7 = pnand %p1665_p6, %p1659_p3 }
  0x10   :  { %1669 = shalt.err (!%p1666_p7)
}
  0x11   :  { %s1721_s19 = smov 128   ;;  %s1722_s20 = smov 8  }
  0x12   :  { %30 = dma.hbm_to_vmem [thread:$0]  %s1900_s1, 12544, %s25_s10, [#allocation3], %s1721_s19, %s1721_s19, %s1722_s20  }
  0x13   :  { %s1723_s23 = smov [#allocation5]   ;;  %s1670_s27 = scalar_lea.hbm %s1902_s3, 2048 }
  0x14   :  { %s38_s24 = sshll.u32 %s1723_s23, 4  ;;  %p1671_p8 = scmp.ne.s32.totalorder %s1902_s3, %s1670_s27  ;;  %s39_s24 = int_to_ptr.vmem [resolvable:$true] %s38_s24 }
  0x15   :  { %p1674_p9 = scmp.lt.u32.totalorder %s1670_s27, %s1902_s3 }
  0x17   :  { %p1676_p10 = pnand %p1674_p9, %p1671_p8 }
  0x19   :  { %1679 = shalt.err (!%p1676_p10)
}
  0x1a   :  { %s1680_s12 = scalar_lea.vmem %s39_s24, 2048  ;;  %p1685_p12 = scmp.lt.s32.totalorder %s39_s24, %s39_s24 }
  0x1b   :  { %p1681_p11 = scmp.ne.s32.totalorder %s39_s24, %s1680_s12  ;;  %p1686_p13 = scmp.lt.s32.totalorder %s1680_s12, %s1680_s12 }
  0x1d   :  { %p1687_p0 = por %p1686_p13, %p1685_p12 }
  0x1f   :  { %p1688_p1 = pnand %p1687_p0, %p1681_p11 }
  0x21   :  { %1691 = shalt.err (!%p1688_p1)
}
  0x22   :  { %s1724_s1 = smov 64   ;;  %s1725_s10 = smov 4  }
  0x23   :  { %44 = dma.hbm_to_vmem [thread:$0]  %s1902_s3, 2048, %s39_s24, [#allocation6], %s1724_s1, %s1724_s1, %s1725_s10  }
  0x24   :  { %1714 = dma.done.wait [#allocation3], 12544  }
  0x25   :  { %1715 = vsyncadd [#allocation3], 4294954752 }
  0x26   :  { %1716 = dma.done.wait [#allocation6], 2048  }
  0x27   :  { %1717 = vsyncadd [#allocation6], 4294965248  ;;  %v1469_v0 = vld [vmem:[#allocation2 + $0x104] ss:$8 sps:$4 sm:$0xff]   ;;  %v1471_v1 = vld [vmem:[#allocation2 + $0x100] ss:$8 sps:$4 sm:$0xff]  }
  0x28   :  { %721 = vmatprep.subr.bf16.mxu0 %v1469_v0  ;;  %v1472_v2 = vld [vmem:[#allocation2 + $0x114] ss:$8 sps:$4 sm:$0xff]   ;;  %v1474_v3 = vld [vmem:[#allocation2 + $0x110] ss:$8 sps:$4 sm:$0xff]   ;;  %v1475_v4 = vld [vmem:[#allocation2 + $0x124] ss:$8 sps:$4 sm:$0xff]  }
  0x29   :  { %722 = vmatpush1.bf16.msra.mxu0 %v1471_v1  ;;  %v1477_v5 = vld [vmem:[#allocation2 + $0x120] ss:$8 sps:$4 sm:$0xff]   ;;  %v1478_v6 = vld [vmem:[#allocation2 + $0x134] ss:$8 sps:$4 sm:$0xff]   ;;  %v1480_v7 = vld [vmem:[#allocation2 + $0x130] ss:$8 sps:$4 sm:$0xff]  }
  0x2a   :  { %723 = vmatprep.subr.bf16.mxu0 %v1472_v2  ;;  %v1481_v8 = vld [vmem:[#allocation2 + $0x144] ss:$8 sps:$4 sm:$0xff]   ;;  %v1483_v9 = vld [vmem:[#allocation2 + $0x140] ss:$8 sps:$4 sm:$0xff]   ;;  %v1484_v10 = vld [vmem:[#allocation2 + $0x154] ss:$8 sps:$4 sm:$0xff]  }
  0x2b   :  { %v1486_v11 = vld [vmem:[#allocation2 + $0x150] ss:$8 sps:$4 sm:$0xff]   ;;  %v1487_v12 = vld [vmem:[#allocation2 + $0x164] ss:$8 sps:$4 sm:$0xff]   ;;  %v1489_v15 = vld [vmem:[#allocation2 + $0x160] ss:$8 sps:$4 sm:$0xff]  }
  0x2c   :  { %v65_v13 = vld [vmem:[%s1899_s0 + $0x18] sm:$0xff]  ;;  %v1523_v17 = vld [vmem:[#allocation2 + $0x4] ss:$8 sps:$4 sm:$0xff]   ;;  %v1528_v20 = vld [vmem:[#allocation2] ss:$8 sps:$4 sm:$0xff]   ;;  %vm676_vm0 = vcmask 130048  }
  0x2d   :  { %724 = vmatpush1.bf16.msra.mxu0 %v1474_v3  ;;  %v72_v14 = vpack.c.bf16 %v65_v13, %v65_v13  ;;  %v1490_v16 = vld [vmem:[#allocation2 + $0x174] ss:$8 sps:$4 sm:$0xff]   ;;  %v1492_v18 = vld [vmem:[#allocation2 + $0x170] ss:$8 sps:$4 sm:$0xff]   ;;  %v1493_v19 = vld [vmem:[#allocation2 + $0x184] ss:$8 sps:$4 sm:$0xff]   ;;  %680 = vmatprep.subr.bf16.mxu1 %v1523_v17 }
  0x2e   :  { %725 = vmatprep.subr.bf16.mxu0 %v1475_v4  ;;  %v1529_v21 = vld [vmem:[#allocation2 + $0x14] ss:$8 sps:$4 sm:$0xff]   ;;  %681 = vmatpush1.bf16.msra.mxu1 %v1528_v20  ;;  %v1534_v22 = vld [vmem:[#allocation2 + $0x10] ss:$8 sps:$4 sm:$0xff]   ;;  %v1535_v23 = vld [vmem:[#allocation2 + $0x24] ss:$8 sps:$4 sm:$0xff]  }
  0x2f   :  { %753 = vmatprep.mubr.bf16.mxu0 %v72_v14  ;;  %682 = vmatprep.subr.bf16.mxu1 %v1529_v21  ;;  %v1495_v24 = vld [vmem:[#allocation2 + $0x180] ss:$8 sps:$4 sm:$0xff]   ;;  %v1496_v25 = vld [vmem:[#allocation2 + $0x194] ss:$8 sps:$4 sm:$0xff]   ;;  %v1498_v28 = vld [vmem:[#allocation2 + $0x190] ss:$8 sps:$4 sm:$0xff]  }
  0x30   :  { %v1540_v26 = vld [vmem:[#allocation2 + $0x20] ss:$8 sps:$4 sm:$0xff]   ;;  %v1541_v27 = vld [vmem:[#allocation2 + $0x34] ss:$8 sps:$4 sm:$0xff]   ;;  %v1499_v29 = vld [vmem:[#allocation2 + $0x1a4] ss:$8 sps:$4 sm:$0xff]  }
  0x31   :  { %726 = vmatpush1.bf16.msra.mxu0 %v1477_v5  ;;  %v1546_v30 = vld [vmem:[#allocation2 + $0x30] ss:$8 sps:$4 sm:$0xff]   ;;  %v1547_v31 = vld [vmem:[#allocation2 + $0x44] ss:$8 sps:$4 sm:$0xff]   ;;  %v1501_v32 = vld [vmem:[#allocation2 + $0x1a0] ss:$8 sps:$4 sm:$0xff]  }
  0x32   :  { %727 = vmatprep.subr.bf16.mxu0 %v1478_v6  ;;  %683 = vmatpush1.bf16.msra.mxu1 %v1534_v22  ;;  %v1502_v33 = vld [vmem:[#allocation2 + $0x1b4] ss:$8 sps:$4 sm:$0xff]   ;;  %v1552_v34 = vld [vmem:[#allocation2 + $0x40] ss:$8 sps:$4 sm:$0xff]   ;;  %v1504_v36 = vld [vmem:[#allocation2 + $0x1b0] ss:$8 sps:$4 sm:$0xff]  }
  0x33   :  { %684 = vmatprep.subr.bf16.mxu1 %v1535_v23  ;;  %v1553_v35 = vld [vmem:[#allocation2 + $0x54] ss:$8 sps:$4 sm:$0xff]   ;;  %v1505_v37 = vld [vmem:[#allocation2 + $0x1c4] ss:$8 sps:$4 sm:$0xff]   ;;  %v1558_v38 = vld [vmem:[#allocation2 + $0x50] ss:$8 sps:$4 sm:$0xff]  }
  0x34   :  { %v1559_v39 = vld [vmem:[#allocation2 + $0x64] ss:$8 sps:$4 sm:$0xff]   ;;  %v1507_v40 = vld [vmem:[#allocation2 + $0x1c0] ss:$8 sps:$4 sm:$0xff]   ;;  %v1508_v41 = vld [vmem:[#allocation2 + $0x1d4] ss:$8 sps:$4 sm:$0xff]  }
  0x35   :  { %728 = vmatpush1.bf16.msra.mxu0 %v1480_v7  ;;  %v1564_v42 = vld [vmem:[#allocation2 + $0x60] ss:$8 sps:$4 sm:$0xff]   ;;  %v1565_v43 = vld [vmem:[#allocation2 + $0x74] ss:$8 sps:$4 sm:$0xff]   ;;  %v1510_v44 = vld [vmem:[#allocation2 + $0x1d0] ss:$8 sps:$4 sm:$0xff]  }
  0x36   :  { %729 = vmatprep.subr.bf16.mxu0 %v1481_v8  ;;  %685 = vmatpush1.bf16.msra.mxu1 %v1540_v26  ;;  %v1511_v45 = vld [vmem:[#allocation2 + $0x1e4] ss:$8 sps:$4 sm:$0xff]   ;;  %v1570_v46 = vld [vmem:[#allocation2 + $0x70] ss:$8 sps:$4 sm:$0xff]   ;;  %v1513_v48 = vld [vmem:[#allocation2 + $0x1e0] ss:$8 sps:$4 sm:$0xff]  }
  0x37   :  { %686 = vmatprep.subr.bf16.mxu1 %v1541_v27  ;;  %v1571_v47 = vld [vmem:[#allocation2 + $0x84] ss:$8 sps:$4 sm:$0xff]   ;;  %v1514_v49 = vld [vmem:[#allocation2 + $0x1f4] ss:$8 sps:$4 sm:$0xff]   ;;  %v1576_v50 = vld [vmem:[#allocation2 + $0x80] ss:$8 sps:$4 sm:$0xff]  }
  0x38   :  { %v1516_v51 = vld [vmem:[#allocation2 + $0x1f0] ss:$8 sps:$4 sm:$0xff]   ;;  %v1577_v52 = vld [vmem:[#allocation2 + $0x94] ss:$8 sps:$4 sm:$0xff]   ;;  %v1519_v54 = vld [vmem:[#allocation2 + $0x204] ss:$8 sps:$4 sm:$0xff]  }
  0x39   :  { %730 = vmatpush1.bf16.msra.mxu0 %v1483_v9  ;;  %v64_v53 = vld [vmem:[%s1899_s0 + $0x10] sm:$0xff]  ;;  %v1583_v56 = vld [vmem:[#allocation2 + $0xa4] ss:$8 sps:$4 sm:$0xff]   ;;  %v1517_v59 = vld [vmem:[#allocation2 + $0x200] ss:$8 sps:$4 sm:$0xff]   ;;  %vm1728_vm1 = vmmov 0  }
  0x3a   :  { %731 = vmatprep.subr.bf16.mxu0 %v1484_v10  ;;  %687 = vmatpush1.bf16.msra.mxu1 %v1546_v30  ;;  %v1582_v55 = vld [vmem:[#allocation2 + $0x90] ss:$8 sps:$4 sm:$0xff]   ;;  %v71_v57 = vpack.c.bf16 %v64_v53, %v64_v53  ;;  %v67_v58 = vld [vmem:[%s1899_s0 + $0x28] sm:$0xff]  ;;  %v1522_v61 = vld [vmem:[#allocation2 + $0x214] ss:$8 sps:$4 sm:$0xff]   ;;  %vm1177_vm2 = vcmask 523264  }
  0x3b   :  { %688 = vmatprep.subr.bf16.mxu1 %v1547_v31  ;;  %v74_v60 = vpack.c.bf16 %v67_v58, %v67_v58  ;;  %v1588_v62 = vld [vmem:[#allocation2 + $0xa0] ss:$8 sps:$4 sm:$0xff]   ;;  %v1589_v63 = vld [vmem:[#allocation2 + $0xb4] ss:$8 sps:$4 sm:$0xff]   ;;  %v1520_v1 = vld [vmem:[#allocation2 + $0x210] ss:$8 sps:$4 sm:$0xff]  }
  0x3c   :  { %v63_v0 = vld [vmem:[%s1899_s0 + $0x8] sm:$0xff]  ;;  %v1594_v4 = vld [vmem:[#allocation2 + $0xb0] ss:$8 sps:$4 sm:$0xff]   ;;  %v1533_v7 = vld [vmem:[#allocation2 + $0x234] ss:$8 sps:$4 sm:$0xff]  }
  0x3d   :  { %732 = vmatpush1.bf16.msra.mxu0 %v1486_v11  ;;  %v70_v2 = vpack.c.bf16 %v63_v0, %v63_v0  ;;  %v1527_v3 = vld [vmem:[#allocation2 + $0x224] ss:$8 sps:$4 sm:$0xff]   ;;  %v1525_v6 = vld [vmem:[#allocation2 + $0x220] ss:$8 sps:$4 sm:$0xff]   ;;  %v1601_v9 = vld [vmem:[#allocation2 + $0xd4] ss:$8 sps:$4 sm:$0xff]  }
  0x3e   :  { %733 = vmatprep.subr.bf16.mxu0 %v1487_v12  ;;  %689 = vmatpush1.bf16.msra.mxu1 %v1552_v34  ;;  %v1595_v5 = vld [vmem:[#allocation2 + $0xc4] ss:$8 sps:$4 sm:$0xff]   ;;  %v1600_v8 = vld [vmem:[#allocation2 + $0xc0] ss:$8 sps:$4 sm:$0xff]   ;;  %v1531_v10 = vld [vmem:[#allocation2 + $0x230] ss:$8 sps:$4 sm:$0xff]  }
  0x3f   :  { %690 = vmatprep.subr.bf16.mxu1 %v1553_v35  ;;  %712 = vmatprep.mubr.bf16.mxu1 %v70_v2  ;;  %v1539_v11 = vld [vmem:[#allocation2 + $0x244] ss:$8 sps:$4 sm:$0xff]   ;;  %v1537_v12 = vld [vmem:[#allocation2 + $0x240] ss:$8 sps:$4 sm:$0xff]   ;;  %v1606_v13 = vld [vmem:[#allocation2 + $0xd0] ss:$8 sps:$4 sm:$0xff]  }
  0x40   :  { %v1607_v14 = vld [vmem:[#allocation2 + $0xe4] ss:$8 sps:$4 sm:$0xff]   ;;  %v1613_v17 = vld [vmem:[#allocation2 + $0xf4] ss:$8 sps:$4 sm:$0xff]   ;;  %v1615_v20 = vld [vmem:[#allocation2 + $0xf0] ss:$8 sps:$4 sm:$0xff]  }
  0x41   :  { %734 = vmatpush1.bf16.msra.mxu0 %v1489_v15  ;;  %v1545_v15 = vld [vmem:[#allocation2 + $0x254] ss:$8 sps:$4 sm:$0xff]   ;;  %v62_v21 = vld [vmem:[%s1899_s0] sm:$0xff]  ;;  %v1622_v35 = vld [vmem:[#allocation5 + $0x58] sm:$0xff]  }
  0x42   :  { %735 = vmatprep.subr.bf16.mxu0 %v1490_v16  ;;  %691 = vmatpush1.bf16.msra.mxu1 %v1558_v38  ;;  %v1612_v16 = vld [vmem:[#allocation2 + $0xe0] ss:$8 sps:$4 sm:$0xff]   ;;  %v1616_v22 = vld [vmem:[#allocation5 + $0x40] sm:$0xff]   ;;  %v69_v26 = vpack.c.bf16 %v62_v21, %v62_v21  ;;  %v1618_v27 = vld [vmem:[#allocation5 + $0x48] sm:$0xff]  }
  0x43   :  { %692 = vmatprep.subr.bf16.mxu1 %v1559_v39  ;;  %v1549_v23 = vld [vmem:[#allocation2 + $0x260] ss:$8 sps:$4 sm:$0xff]   ;;  %v1619_v30 = vld [vmem:[#allocation5 + $0x8] sm:$0xff]   ;;  %v1624_v39 = vld [vmem:[#allocation5 + $0x60] sm:$0xff]  }
  0x44   :  { %v1620_v31 = vld [vmem:[#allocation5 + $0x50] sm:$0xff]   ;;  %v1623_v38 = vld [vmem:[#allocation5 + $0x18] sm:$0xff]  }
  0x45   :  { %736 = vmatpush1.bf16.msra.mxu0 %v1492_v18  ;;  %v1543_v18 = vld [vmem:[#allocation2 + $0x250] ss:$8 sps:$4 sm:$0xff]   ;;  %v1621_v34 = vld [vmem:[#allocation5 + $0x10] sm:$0xff]   ;;  %v1631_v0 = vld [vmem:[#allocation5 + $0x38] sm:$0xff]  }
  0x46   :  { %737 = vmatprep.subr.bf16.mxu0 %v1493_v19  ;;  %693 = vmatpush1.bf16.msra.mxu1 %v1564_v42  ;;  %v1551_v19 = vld [vmem:[#allocation2 + $0x264] ss:$8 sps:$4 sm:$0xff]   ;;  %v1625_v42 = vld [vmem:[#allocation5 + $0x20] sm:$0xff]  }
  0x47   :  { %694 = vmatprep.subr.bf16.mxu1 %v1565_v43  ;;  %v1579_v43 = vld [vmem:[#allocation2 + $0x2b0] ss:$8 sps:$4 sm:$0xff]   ;;  %v1611_v53 = vld [vmem:[#allocation2 + $0x304] ss:$8 sps:$4 sm:$0xff]  }
  0x49   :  { %738 = vmatpush1.bf16.msra.mxu0 %v1495_v24  ;;  %v1557_v24 = vld [vmem:[#allocation2 + $0x274] ss:$8 sps:$4 sm:$0xff]  }
  0x4a   :  { %739 = vmatprep.subr.bf16.mxu0 %v1496_v25  ;;  %695 = vmatpush1.bf16.msra.mxu1 %v1570_v46  ;;  %v1617_v25 = vld [vmem:[#allocation5] sm:$0xff]  }
  0x4b   :  { %696 = vmatprep.subr.bf16.mxu1 %v1571_v47  ;;  %v1593_v46 = vld [vmem:[#allocation2 + $0x2d4] ss:$8 sps:$4 sm:$0xff]   ;;  %v1591_v47 = vld [vmem:[#allocation2 + $0x2d0] ss:$8 sps:$4 sm:$0xff]  }
  0x4d   :  { %740 = vmatpush1.bf16.msra.mxu0 %v1498_v28  ;;  %v1555_v28 = vld [vmem:[#allocation2 + $0x270] ss:$8 sps:$4 sm:$0xff]  }
  0x4e   :  { %741 = vmatprep.subr.bf16.mxu0 %v1499_v29  ;;  %697 = vmatpush1.bf16.msra.mxu1 %v1576_v50  ;;  %v1563_v29 = vld [vmem:[#allocation2 + $0x284] ss:$8 sps:$4 sm:$0xff]   ;;  %v1605_v50 = vld [vmem:[#allocation2 + $0x2f4] ss:$8 sps:$4 sm:$0xff]  }
  0x4f   :  { %698 = vmatprep.subr.bf16.mxu1 %v1577_v52  ;;  %v66_v52 = vld [vmem:[%s1899_s0 + $0x20] sm:$0xff] }
  0x51   :  { %742 = vmatpush1.bf16.msra.mxu0 %v1501_v32  ;;  %v1561_v32 = vld [vmem:[#allocation2 + $0x280] ss:$8 sps:$4 sm:$0xff]  }
  0x52   :  { %743 = vmatprep.subr.bf16.mxu0 %v1502_v33  ;;  %699 = vmatpush1.bf16.msra.mxu1 %v1582_v55  ;;  %v1569_v33 = vld [vmem:[#allocation2 + $0x294] ss:$8 sps:$4 sm:$0xff]   ;;  %v1609_v55 = vld [vmem:[#allocation2 + $0x300] ss:$8 sps:$4 sm:$0xff]  }
  0x53   :  { %700 = vmatprep.subr.bf16.mxu1 %v1583_v56  ;;  %v1726_v56 = vmov 0  }
  0x55   :  { %744 = vmatpush1.bf16.msra.mxu0 %v1504_v36  ;;  %v1567_v36 = vld [vmem:[#allocation2 + $0x290] ss:$8 sps:$4 sm:$0xff]  }
  0x56   :  { %745 = vmatprep.subr.bf16.mxu0 %v1505_v37  ;;  %701 = vmatpush1.bf16.msra.mxu1 %v1588_v62  ;;  %v1575_v37 = vld [vmem:[#allocation2 + $0x2a4] ss:$8 sps:$4 sm:$0xff]  }
  0x57   :  { %702 = vmatprep.subr.bf16.mxu1 %v1589_v63  ;;  %v1629_v62 = vld [vmem:[#allocation5 + $0x30] sm:$0xff]   ;;  %v1630_v63 = vld [vmem:[#allocation5 + $0x78] sm:$0xff]  }
  0x59   :  { %746 = vmatpush1.bf16.msra.mxu0 %v1507_v40  ;;  %v1573_v40 = vld [vmem:[#allocation2 + $0x2a0] ss:$8 sps:$4 sm:$0xff]  }
  0x5a   :  { %747 = vmatprep.subr.bf16.mxu0 %v1508_v41  ;;  %703 = vmatpush1.bf16.msra.mxu1 %v1594_v4  ;;  %v1581_v41 = vld [vmem:[#allocation2 + $0x2b4] ss:$8 sps:$4 sm:$0xff]  }
  0x5b   :  { %704 = vmatprep.subr.bf16.mxu1 %v1595_v5 }
  0x5d   :  { %748 = vmatpush1.bf16.msra.mxu0 %v1510_v44  ;;  %v1587_v44 = vld [vmem:[#allocation2 + $0x2c4] ss:$8 sps:$4 sm:$0xff]  }
  0x5e   :  { %749 = vmatprep.subr.bf16.mxu0 %v1511_v45  ;;  %705 = vmatpush1.bf16.msra.mxu1 %v1600_v8  ;;  %v1585_v45 = vld [vmem:[#allocation2 + $0x2c0] ss:$8 sps:$4 sm:$0xff]  }
  0x5f   :  { %706 = vmatprep.subr.bf16.mxu1 %v1601_v9  ;;  %v174_v9 = vld [vmem:[%s1901_s2] sm:$0x3] }
  0x61   :  { %750 = vmatpush1.bf16.msra.mxu0 %v1513_v48  ;;  %v1599_v48 = vld [vmem:[#allocation2 + $0x2e4] ss:$8 sps:$4 sm:$0xff]  }
  0x62   :  { %751 = vmatprep.subr.bf16.mxu0 %v1514_v49  ;;  %707 = vmatpush1.bf16.msra.mxu1 %v1606_v13  ;;  %v1597_v49 = vld [vmem:[#allocation2 + $0x2e0] ss:$8 sps:$4 sm:$0xff]  }
  0x63   :  { %708 = vmatprep.subr.bf16.mxu1 %v1607_v14 }
  0x65   :  { %752 = vmatpush1.bf16.msra.mxu0 %v1516_v51  ;;  %v1603_v51 = vld [vmem:[#allocation2 + $0x2f0] ss:$8 sps:$4 sm:$0xff]  }
  0x66   :  { %762 = vmatprep.subr.bf16.mxu0 %v1519_v54  ;;  %709 = vmatpush1.bf16.msra.mxu1 %v1612_v16  ;;  %v73_v54 = vpack.c.bf16 %v66_v52, %v66_v52 }
  0x67   :  { %710 = vmatprep.subr.bf16.mxu1 %v1613_v17 }
  0x68   :  { %754 = vmatmul.mubr.bf16.vlgmr.msra.gmra.mrb[0].mxu0 %v71_v57  ;;  %v68_v57 = vld [vmem:[%s1899_s0 + $0x30] sm:$0xff] }
  0x69   :  { %763 = vmatpush1.bf16.msra.mxu0 %v1517_v59  ;;  %794 = vmatprep.mubr.bf16.mxu0 %v74_v60  ;;  %v75_v58 = vpack.c.bf16 %v68_v57, %v68_v57  ;;  %v1626_v59 = vld [vmem:[#allocation5 + $0x68] sm:$0xff]  }
  0x6a   :  { %764 = vmatprep.subr.bf16.mxu0 %v1522_v61  ;;  %711 = vmatpush1.bf16.msra.mxu1 %v1615_v20  ;;  %v1627_v60 = vld [vmem:[#allocation5 + $0x28] sm:$0xff]   ;;  %v1628_v61 = vld [vmem:[#allocation5 + $0x70] sm:$0xff]  }
  0x6b   :  { %1379 = vmatprep.subr.bf16.mxu1 %v1616_v22 }
  0x6d   :  { %765 = vmatpush1.bf16.msra.mxu0 %v1520_v1  ;;  %713 = vmatmul.mubr.bf16.vlgmr.msra.gmra.mrb[0].mxu1 %v69_v26  ;;  %v1727_v1 = vmov 0.0   ;;  %v1633_v26 = vld [vmem:[%s1904_s5 + $0x8] sm:$0xff]  }
  0x6e   :  { %766 = vmatprep.subr.bf16.mxu0 %v1527_v3  ;;  %1380 = vmatpush3.bf16.msra.mxu1 %v1617_v25 }
  0x6f   :  { %1381 = vmatprep.subr.bf16.mxu1 %v1618_v27  ;;  %v1634_v27 = vld [vmem:[%s1904_s5 + $0x10] sm:$0xff]  }
  0x71   :  { %767 = vmatpush1.bf16.msra.mxu0 %v1525_v6  ;;  %v176_v6 = vlaneseq }
  0x72   :  { %768 = vmatprep.subr.bf16.mxu0 %v1533_v7  ;;  %1382 = vmatpush3.bf16.msra.mxu1 %v1619_v30  ;;  %v1637_v30 = vld [vmem:[%s1904_s5 + $0x28] sm:$0xff]  }
  0x73   :  { %1383 = vmatprep.subr.bf16.mxu1 %v1620_v31  ;;  %v177_v7 = vshrl.u32 %v176_v6, 7  ;;  %v1638_v31 = vld [vmem:[%s1904_s5 + $0x30] sm:$0xff]  }
  0x75   :  { %769 = vmatpush1.bf16.msra.mxu0 %v1531_v10  ;;  %v178_v8 = vsub.s32 0, %v177_v7  ;;  %v182_v10 = vsub.s32 1, %v177_v7 }
  0x76   :  { %770 = vmatprep.subr.bf16.mxu0 %v1539_v11  ;;  %1384 = vmatpush3.bf16.msra.mxu1 %v1621_v34  ;;  %v1347_v34 = vld [vmem:[%s1903_s4] ss:$0 sm:$0xff] }
  0x77   :  { %1385 = vmatprep.subr.bf16.mxu1 %v1622_v35  ;;  %v179_v11 = vrot.slane %v174_v9, %v178_v8 }
  0x79   :  { %771 = vmatpush1.bf16.msra.mxu0 %v1537_v12  ;;  %v183_v12 = vrot.slane %v174_v9, %v182_v10 }
  0x7a   :  { %772 = vmatprep.subr.bf16.mxu0 %v1545_v15  ;;  %1386 = vmatpush3.bf16.msra.mxu1 %v1623_v38 }
  0x7b   :  { %1387 = vmatprep.subr.bf16.mxu1 %v1624_v39 }
  0x7d   :  { %773 = vmatpush1.bf16.msra.mxu0 %v1543_v18 }
  0x7e   :  { %774 = vmatprep.subr.bf16.mxu0 %v1551_v19  ;;  %1388 = vmatpush3.bf16.msra.mxu1 %v1625_v42 }
  0x7f   :  { %1389 = vmatprep.subr.bf16.mxu1 %v1626_v59 }
  0x81   :  { %775 = vmatpush1.bf16.msra.mxu0 %v1549_v23 }
  0x82   :  { %776 = vmatprep.subr.bf16.mxu0 %v1557_v24  ;;  %1390 = vmatpush3.bf16.msra.mxu1 %v1627_v60  ;;  %v1632_v24 = vld [vmem:[%s1904_s5] sm:$0xff]  }
  0x83   :  { %1391 = vmatprep.subr.bf16.mxu1 %v1628_v61 }
  0x85   :  { %777 = vmatpush1.bf16.msra.mxu0 %v1555_v28  ;;  %v1635_v28 = vld [vmem:[%s1904_s5 + $0x18] sm:$0xff]  }
  0x86   :  { %778 = vmatprep.subr.bf16.mxu0 %v1563_v29  ;;  %1392 = vmatpush3.bf16.msra.mxu1 %v1629_v62  ;;  %v1636_v29 = vld [vmem:[%s1904_s5 + $0x20] sm:$0xff]  }
  0x87   :  { %1393 = vmatprep.subr.bf16.mxu1 %v1630_v63 }
  0x89   :  { %779 = vmatpush1.bf16.msra.mxu0 %v1561_v32  ;;  %v1639_v32 = vld [vmem:[%s1904_s5 + $0x38] sm:$0xff]  }
  0x8a   :  { %780 = vmatprep.subr.bf16.mxu0 %v1569_v33  ;;  %1394 = vmatpush3.bf16.msra.mxu1 %v1631_v0 }
  0x8b   :  { %1415 = vmatprep.subr.bf16.mxu1 %v1727_v1 }
  0x8d   :  { %781 = vmatpush1.bf16.msra.mxu0 %v1567_v36 }
  0x8e   :  { %782 = vmatprep.subr.bf16.mxu0 %v1575_v37 }
  0x91   :  { %783 = vmatpush1.bf16.msra.mxu0 %v1573_v40 }
  0x92   :  { %784 = vmatprep.subr.bf16.mxu0 %v1581_v41  ;;  %v1640_v41 = vld [vmem:[%s1906_s7] sm:$0xff]  }
  0x95   :  { %785 = vmatpush1.bf16.msra.mxu0 %v1579_v43  ;;  %v1641_v43 = vld [vmem:[%s1906_s7 + $0x8] sm:$0xff]  }
  0x96   :  { %786 = vmatprep.subr.bf16.mxu0 %v1587_v44  ;;  %v1642_v44 = vld [vmem:[%s1906_s7 + $0x10] sm:$0xff]  }
  0x99   :  { %787 = vmatpush1.bf16.msra.mxu0 %v1585_v45  ;;  %v1643_v45 = vld [vmem:[%s1906_s7 + $0x18] sm:$0xff]  }
  0x9a   :  { %788 = vmatprep.subr.bf16.mxu0 %v1593_v46  ;;  %v1364_v46 = vld [vmem:[%s1905_s6] ss:$0 sm:$0xff]  ;;  %s1729_s6 = smov [#allocation7]  }
  0x9b   :  { %s1238_s7 = sshll.u32 %s1729_s6, 4  ;;  %s1239_s7 = int_to_ptr.vmem [resolvable:$true] %s1238_s7 }
  0x9c   :  { %p1697_p3 = scmp.lt.s32.totalorder %s1239_s7, %s1239_s7 }
  0x9d   :  { %789 = vmatpush1.bf16.msra.mxu0 %v1591_v47 }
  0x9e   :  { %790 = vmatprep.subr.bf16.mxu0 %v1599_v48 }
  0xa1   :  { %791 = vmatpush1.bf16.msra.mxu0 %v1597_v49 }
  0xa2   :  { %792 = vmatprep.subr.bf16.mxu0 %v1605_v50 }
  0xa5   :  { %793 = vmatpush1.bf16.msra.mxu0 %v1603_v51 }
  0xa6   :  { %803 = vmatprep.subr.bf16.mxu0 %v1611_v53 }
  0xa8   :  { %795 = vmatmul.mubr.bf16.vlgmr.msra.gmra.mrb[0].mxu0 %v73_v54  ;;  %v1373_v54 = vld [vmem:[%s1907_s8] ss:$0 sm:$0xff]  ;;  %s1692_s8 = scalar_lea.vmem %s1239_s7, 128 }
  0xa9   :  { %804 = vmatpush1.bf16.msra.mxu0 %v1609_v55  ;;  %835 = vmatprep.mubr.bf16.mxu0 %v1726_v56  ;;  %p1693_p2 = scmp.ne.s32.totalorder %s1239_s7, %s1692_s8  ;;  %p1698_p4 = scmp.lt.s32.totalorder %s1692_s8, %s1692_s8 }
  0xab   :  { %p1699_p5 = por %p1698_p4, %p1697_p3 }
  0xad   :  { %p1700_p6 = pnand %p1699_p5, %p1693_p2 }
  0xb4   :  { %1346 = vmatmul.mubr.msk.bf16.vlgmr.msra.gmra.mrb[0].mxu0 %vm676_vm0, %v75_v58 }
 0x140   :  { %v714_v2 = vpop.f32.mrb[0].mxu1 }
 0x141   :  { %v716_v3 = vpop.f32.mrb[1].mxu1  ;;  %v715_v13 = vadd.f32 %v714_v2, %v179_v11 }
 0x142   :  { %v718_v4 = vpop.f32.mrb[2].mxu1  ;;  %v717_v14 = vadd.f32 %v716_v3, %v183_v12 }
 0x143   :  { %v719_v5 = vpop.f32.mrb[3].mxu1 }
 0x187   :  { %v837_v15 = vpop.f32.mrb[0].mxu0 }
 0x188   :  { %v1448_v16 = vadd.f32 %v837_v15, %v715_v13  ;;  %v839_v17 = vpop.f32.mrb[1].mxu0 }
 0x189   :  { %v1450_v18 = vadd.f32 %v839_v17, %v717_v14  ;;  %v841_v19 = vpop.f32.mrb[2].mxu0 }
 0x18a   :  { %v844_v20 = vmax.f32 %v1448_v16, 0.0  ;;  %v842_v21 = vpop.f32.mrb[3].mxu0 }
 0x18b   :  { %v845_v22 = vmax.f32 %v1450_v18, 0.0 }
 0x18c   :  { %v846_v25 = vpack.c.bf16 %v844_v20, %v844_v20 }
 0x18d   :  { %v847_v23 = vpack.c.bf16 %v845_v22, %v845_v22 }
 0x18f   :  { %1015 = vmatprep.mubr.bf16.mxu1 %v847_v23 }
 0x190   :  { %1016 = vmatmul.mubr.bf16.vlgmr.msra.gmra.mrb[4].mxu1 %v846_v25 }
 0x191   :  { %1416 = vmatpush3.bf16.msra.mxu1 %v1632_v24  ;;  %1431 = vmatprep.mubr.msk.bf16.mxu1 %vm1728_vm1, %v1727_v1 }
 0x192   :  { %1417 = vmatprep.subr.bf16.mxu1 %v1727_v1 }
 0x195   :  { %1418 = vmatpush3.bf16.msra.mxu1 %v1633_v26 }
 0x196   :  { %1419 = vmatprep.subr.bf16.mxu1 %v1727_v1 }
 0x199   :  { %1420 = vmatpush3.bf16.msra.mxu1 %v1634_v27 }
 0x19a   :  { %1421 = vmatprep.subr.bf16.mxu1 %v1727_v1 }
 0x19d   :  { %1422 = vmatpush3.bf16.msra.mxu1 %v1635_v28 }
 0x19e   :  { %1423 = vmatprep.subr.bf16.mxu1 %v1727_v1 }
 0x1a1   :  { %1424 = vmatpush3.bf16.msra.mxu1 %v1636_v29 }
 0x1a2   :  { %1425 = vmatprep.subr.bf16.mxu1 %v1727_v1 }
 0x1a5   :  { %1426 = vmatpush3.bf16.msra.mxu1 %v1637_v30 }
 0x1a6   :  { %1427 = vmatprep.subr.bf16.mxu1 %v1727_v1 }
 0x1a9   :  { %1428 = vmatpush3.bf16.msra.mxu1 %v1638_v31 }
 0x1aa   :  { %1429 = vmatprep.subr.bf16.mxu1 %v1727_v1 }
 0x1ad   :  { %1430 = vmatpush3.bf16.msra.mxu1 %v1639_v32 }
 0x1ae   :  { %1435 = vmatprep.subr.bf16.mxu1 %v1727_v1 }
 0x263   :  { %v1395_v33 = vpop.f32.mrb[4].mxu1 }
 0x264   :  { %v1396_v35 = vpop.f32.mrb[5].mxu1 }
 0x265   :  { %v1397_v36 = vadd.f32 %v1396_v35, %v1395_v33  ;;  %v1398_v37 = vpop.f32.mrb[6].mxu1 }
 0x266   :  { %v1399_v38 = vpop.f32.mrb[7].mxu1 }
 0x267   :  { %v1018_v39 = vadd.f32 %v1397_v36, %v1347_v34 }
 0x269   :  { %v1023_v40 = vmax.f32 %v1018_v39, 0.0 }
 0x26b   :  { %v1024_v42 = vpack.c.bf16 %v1023_v40, %v1023_v40 }
 0x26d   :  { %1432 = vmatmul.mubr.bf16.vlgmr.msra.gmra.mrb[8].mxu1 %v1024_v42 }
 0x26e   :  { %1436 = vmatpush3.bf16.msra.mxu1 %v1640_v41  ;;  %1443 = vmatprep.mubr.msk.bf16.mxu1 %vm1728_vm1, %v1727_v1 }
 0x26f   :  { %1437 = vmatprep.subr.bf16.mxu1 %v1727_v1 }
 0x272   :  { %1438 = vmatpush3.bf16.msra.mxu1 %v1641_v43 }
 0x273   :  { %1439 = vmatprep.subr.bf16.mxu1 %v1727_v1 }
 0x276   :  { %1440 = vmatpush3.bf16.msra.mxu1 %v1642_v44 }
 0x277   :  { %1441 = vmatprep.subr.bf16.mxu1 %v1727_v1 }
 0x27a   :  { %1442 = vmatpush3.bf16.msra.mxu1 %v1643_v45 }
 0x340   :  { %v1130_v47 = vpop.f32.mrb[8].mxu1 }
 0x341   :  { %v1131_v48 = vadd.f32 %v1364_v46, %v1130_v47  ;;  %v1433_v49 = vpop.f32.mrb[9].mxu1 }
 0x342   :  { %v1133_v50 = vpop.f32.mrb[10].mxu1 }
 0x343   :  { %v1136_v51 = vmax.f32 %v1131_v48, 0.0  ;;  %v1434_v52 = vpop.f32.mrb[11].mxu1 }
 0x345   :  { %v1137_v53 = vpack.c.bf16 %v1136_v51, %v1136_v51 }
 0x347   :  { %1444 = vmatmul.mubr.msk.bf16.vlgmr.msra.gmra.mrb[12].mxu1 %vm1177_vm2, %v1137_v53 }
 0x41a   :  { %v1215_v55 = vpop.f32.mrb[12].mxu1 }
 0x41b   :  { %v1216_v56 = vadd.f32 %v1373_v54, %v1215_v55  ;;  %v1445_v57 = vpop.f32.mrb[13].mxu1 }
 0x41c   :  { %v1218_v58 = vpop.f32.mrb[14].mxu1 }
 0x41d   :  { %1221 = vmax.xlane.f32.xlu0 %v1216_v56  ;;  %v1446_v59 = vpop.f32.mrb[15].mxu1 }
 0x4aa   :  { %v1222_v60 = vpop.xlane.xlu0 %1221 }
 0x4ab   :  { %v1223_v61 = vsub.f32 %v1216_v56, %v1222_v60 }
 0x4ad   :  { %v1224_v62 = vmul.f32 1.442695, %v1223_v61 }
 0x4af   :  { %1644 = vpow2.f32 %v1224_v62 }
 0x4b9   :  { %v1645_v63 = vpop.eup %1644 }
 0x4ba   :  { %1226 = vadd.xlane.f32.xlu0 %v1645_v63 }
 0x547   :  { %v1227_v0 = vpop.xlane.xlu0 %1226 }
 0x548   :  { %1646 = vlog2.f32 %v1227_v0 }
 0x552   :  { %v1647_v1 = vpop.eup %1646 }
 0x553   :  { %v1229_v2 = vmul.f32 0.6931472, %v1647_v1 }
 0x555   :  { %v1230_v3 = vsub.f32 %v1223_v61, %v1229_v2 }
 0x557   :  { %1231 = vst [vmem:[#allocation7] sm:$0xff] %v1230_v3 }
 0x558   :  { %1703 = shalt.err (!%p1700_p6)
}
 0x559   :  { %s1704_s1 = scalar_lea.hbm %s1908_s9, 128 }
 0x55a   :  { %p1705_p7 = scmp.ne.s32.totalorder %s1908_s9, %s1704_s1  ;;  %p1708_p8 = scmp.lt.u32.totalorder %s1704_s1, %s1908_s9 }
 0x55c   :  { %p1710_p9 = pnand %p1708_p8, %p1705_p7 }
 0x55e   :  { %1713 = shalt.err (!%p1710_p9)
}
 0x55f   :  { %1241 = dma.vmem_to_hbm [thread:$0]  %s1239_s7, 128, %s1908_s9, [#allocation4]  }
 0x560   :  { %1718 = dma.done.wait [#allocation4], 128  }
 0x561   :  { %1719 = vsyncadd [#allocation4], 4294967168 }
 0x562   :  { %1245 = vsyncpa [#allocation3], 1 }
 0x563   :  { %1246 = vsyncpa [#allocation6], 1 }
 0x564   :  { %1247 = vsyncpa [#allocation4], 1 }

</bundles_post_ra>
